<compile_context>
chip_gen: v7x
topology: tpu7x:2x2x1
jax: 0.10.0
libtpu: 0.0.40
codegen_flags: <defaults>
</compile_context>

<pallas_src>
import functools

import jax
import jax.numpy as jnp
from jax import lax
from jax.experimental import pallas as pl
from jax.experimental.pallas import tpu as pltpu


LOGINF = 1.0e6          # matches the reference "loginf"
NEG_MASK = -1.0e30      # exclusion sentinel for terms the reference never includes in logsumexp


# ----------------------------------------------------------------------------- #
# Kernel 1: vocab projection + log_softmax + gather(target) + gather(eos)
#   h_ref  : (D, TM)  bf16   rows on the lane axis
#   tgt_ref: (1, TM)  int32
#   w_ref  : (V, D)   bf16   tied embedding weight (emb), so logits = emb @ h
#   b_ref  : (V, 1)   f32
#   out    : (2, TM)  f32    row 0 = log p(target), row 1 = log p(eos)
# ----------------------------------------------------------------------------- #
def _vocab_logprob_kernel(h_ref, tgt_ref, w_ref, b_ref, out_ref, *, eos_id: int):
    logits = jnp.dot(w_ref[...], h_ref[...],
                     preferred_element_type=jnp.float32)              # (V, TM) f32
    logits = logits + b_ref[...]                                      # bias broadcast over lanes

    m = jnp.max(logits, axis=0, keepdims=True)                        # (1, TM)
    lse = m + jnp.log(jnp.sum(jnp.exp(logits - m), axis=0, keepdims=True))

    vocab_iota = lax.broadcasted_iota(jnp.int32, logits.shape, 0)     # vocab ids along sublanes
    tgt = tgt_ref[...]                                                # (1, TM)
    tgt_logit = jnp.sum(jnp.where(vocab_iota == tgt, logits, 0.0),
                        axis=0, keepdims=True)                        # (1, TM)
    eos_logit = logits[eos_id:eos_id + 1, :]                          # static sublane slice

    out_ref[...] = jnp.concatenate([tgt_logit - lse, eos_logit - lse], axis=0)  # (2, TM)


def vocab_logprobs(h, tgt, emb, b, eos_id, *, tm_max=512):
    """h: (N, D) f32, tgt: (N,) int32, emb: (V, D), b: (V,) -> (tgt_lp, eos_lp) each (N,)."""
    n, d = h.shape
    v = emb.shape[0]

    n_pad = max(128, ((n + 127) // 128) * 128)        # lane-dense rows, multiple of 128
    if n_pad <= tm_max:
        tm = n_pad                                    # single grid step for small problems
    else:
        tm = tm_max
        n_pad = ((n_pad + tm - 1) // tm) * tm

    h_t = jnp.zeros((d, n_pad), jnp.bfloat16).at[:, :n].set(h.T.astype(jnp.bfloat16))
    t_p = jnp.zeros((1, n_pad), jnp.int32).at[0, :n].set(tgt)
    w = emb.astype(jnp.bfloat16)                      # (V, D)
    b2 = b.reshape(v, 1).astype(jnp.float32)

    kern = functools.partial(_vocab_logprob_kernel, eos_id=eos_id)
    out = pl.pallas_call(
        kern,
        out_shape=jax.ShapeDtypeStruct((2, n_pad), jnp.float32),
        grid=(n_pad // tm,),
        in_specs=[pl.BlockSpec((d, tm), lambda i: (0, i)),
                  pl.BlockSpec((1, tm), lambda i: (0, i)),
                  pl.BlockSpec((v, d), lambda i: (0, 0)),
                  pl.BlockSpec((v, 1), lambda i: (0, 0))],
        out_specs=pl.BlockSpec((2, tm), lambda i: (0, i)),
        compiler_params=pltpu.CompilerParams(dimension_semantics=("parallel",)),
    )(h_t, t_p, w, b2)
    return out[0, :n], out[1, :n]


# ----------------------------------------------------------------------------- #
# Kernel 2: alpha forward DP  alpha[e] = logsumexp_k(alpha[e-1-k] + logpy[e-k, k])
#   lp_ref   : (T-1, S, B_pad) f32 with lp[e,k] = logpy[e-k, k] (NEG_MASK where k >= e)
#   alpha_ref: (T-1, B_pad)    f32
# The last S alpha rows are carried as a rolling (S, B_pad) window in vregs; alpha_ref is
# only written (once per step), never re-read inside the loop.
# ----------------------------------------------------------------------------- #
def _alpha_kernel(lp_ref, alpha_ref):
    t_m1, s, b = lp_ref.shape

    alpha_ref[pl.ds(0, 1), :] = jnp.zeros((1, b), jnp.float32)        # alpha[0] = 0

    # window[k] = alpha[e-1-k]; invalid slots masked via NEG_MASK in lp
    win0 = jnp.concatenate(
        [jnp.zeros((1, b), jnp.float32),
         jnp.full((s - 1, b), -LOGINF, jnp.float32)], axis=0)         # (S, B)

    def body(e, win):
        t = win + lp_ref[e]                                           # (S, B)
        m = jnp.max(t, axis=0, keepdims=True)
        lse = m + jnp.log(jnp.sum(jnp.exp(t - m), axis=0, keepdims=True))   # (1, B)
        alpha_ref[pl.ds(e, 1), :] = lse
        return jnp.concatenate([lse, win[:s - 1, :]], axis=0)         # shift window

    lax.fori_loop(1, t_m1, body, win0, unroll=True)


def alpha_forward(lp_shift_padded):
    """lp_shift_padded: (T-1, S, B_pad) f32 -> alpha (T-1, B_pad) f32."""
    t_m1, s, b = lp_shift_padded.shape
    return pl.pallas_call(
        _alpha_kernel,
        out_shape=jax.ShapeDtypeStruct((t_m1, b), jnp.float32),
        in_specs=[pl.BlockSpec((t_m1, s, b), lambda: (0, 0, 0))],
        out_specs=pl.BlockSpec((t_m1, b), lambda: (0, 0)),
    )(lp_shift_padded)


# ----------------------------------------------------------------------------- #
# SegmentalLM forward (unsupervised)
# ----------------------------------------------------------------------------- #
def make_params(key, vocab_size, d_model):
    ks = jax.random.split(key, 10)
    scale = 0.1
    p = {
        "emb": jax.random.uniform(ks[0], (vocab_size, d_model), jnp.float32, -1.0, 1.0),
        "W_enc": scale * jax.random.normal(ks[1], (d_model, d_model), jnp.float32),
        "b_enc": jnp.zeros((d_model,), jnp.float32),
        "W_start": scale * jax.random.normal(ks[2], (d_model, d_model), jnp.float32),
        "b_start": jnp.zeros((d_model,), jnp.float32),
        "W_x": scale * jax.random.normal(ks[3], (d_model, d_model), jnp.float32),
        "W_h": scale * jax.random.normal(ks[4], (d_model, d_model), jnp.float32),
        "b_h": jnp.zeros((d_model,), jnp.float32),
        "W_o": scale * jax.random.normal(ks[5], (d_model, d_model), jnp.float32),
        "b_o": jnp.zeros((d_model,), jnp.float32),
        "b_vocab": jnp.zeros((vocab_size,), jnp.float32),
    }
    return p


def segmental_lm_forward(params, x, lengths, config):
    """x: (batch, seq) int32 tokens.  lengths: static python list.  Returns normalized NLL."""
    V = config["vocab_size"]
    D = config["embedding_size"]
    S = config["max_segment_length"]
    eos_id = config["eos_id"]

    B, T_seq = x.shape
    T = max(lengths)                       # max_length in the reference
    n_starts = T - 2

    x_t = x.T                              # (seq, batch) -- reference's x.transpose(0,1)

    # --- context encoder (synthetic): embeds + per-token hidden --------------- #
    embeds_bt = params["emb"][x]                                       # (B, T_seq, D)
    dec_hidden_bt = jnp.tanh(embeds_bt @ params["W_enc"] + params["b_enc"])
    inputs = jnp.transpose(embeds_bt, (1, 0, 2))                       # (seq, B, D)
    encoder_output = jnp.transpose(dec_hidden_bt, (1, 0, 2)) * 0.5     # (seq, B, D)

    # is_single penalty
    sing_mask = ((x_t == config["punc_id"]) | (x_t == config["eng_id"]) |
                 (x_t == config["num_id"]))
    is_single = -LOGINF * sing_mask.astype(jnp.float32)                # (seq, B)

    # start-symbol hidden for every position
    seg_dec_hiddens = jnp.tanh(encoder_output @ params["W_start"] + params["b_start"])

    # --- segment decoder (tanh RNN), vectorized over all j_start -------------- #
    h0 = seg_dec_hiddens[0:n_starts]                                   # (n_starts, B, D)
    o0 = h0 @ params["W_o"] + params["b_o"]

    def rnn_step(h_prev, k):
        idx = jnp.minimum(jnp.arange(1, n_starts + 1) + k - 1, T_seq - 1)
        x_k = inputs[idx]                                              # (n_starts, B, D)
        h_new = jnp.tanh(x_k @ params["W_x"] + h_prev @ params["W_h"] + params["b_h"])
        return h_new, h_new @ params["W_o"] + params["b_o"]

    _, os = lax.scan(rnn_step, h0, jnp.arange(1, S + 1))
    O = jnp.concatenate([o0[None], os], axis=0)                        # (S+1, n_starts, B, D)

    # targets for each (step, j_start, batch)
    step_ids = jnp.arange(S + 1)
    pos_full = jnp.minimum(step_ids[:, None] + jnp.arange(1, n_starts + 1)[None, :],
                           T_seq - 1)                                  # (S+1, n_starts)
    targets = x_t[pos_full]                                            # (S+1, n_starts, B)

    N = (S + 1) * n_starts * B
    tgt_lp_f, eos_lp_f = vocab_logprobs(
        O.reshape(N, D), targets.reshape(N).astype(jnp.int32),
        params["emb"], params["b_vocab"], eos_id)
    tgt_lp = tgt_lp_f.reshape(S + 1, n_starts, B)
    eos_lp = eos_lp_f.reshape(S + 1, n_starts, B)

    # --- logpy table (exactly as in the reference j_start loop) --------------- #
    cum_tgt = jnp.cumsum(tgt_lp[:S], axis=0)                           # (S, n_starts, B)

    j_start = jnp.arange(1, n_starts + 1)                              # (n_starts,)
    k_arr = jnp.arange(S)
    pos = j_start[None, :] + k_arr[:, None]                            # (S, n_starts) = j_start+k
    pos_c = jnp.minimum(pos, T_seq - 1)
    sing_at = is_single[pos_c]                                         # (S, n_starts, B)
    sing_cs = jnp.cumsum(sing_at, axis=0)
    single_term = jnp.where(k_arr[:, None, None] == 0, 0.0, sing_cs)

    # impact_matrix is zeros (is_impacted=False) -> impact = -1 except at j == T-2
    impact = jnp.where(pos[:, :, None] == (T - 2), 0.0, -1.0)
    eos_term = eos_lp[1:S + 1]
    valid = (k_arr[:, None] < (T - 1 - j_start[None, :]))[:, :, None]

    core = cum_tgt + single_term + eos_term + impact
    core = jnp.where(valid, core, -LOGINF)                             # (S, n_starts, B)

    logpy = jnp.full((T - 1, S, B), -LOGINF, jnp.float32)
    logpy = logpy.at[0, 0].set(0.0)
    logpy = logpy.at[1:, :, :].set(jnp.transpose(core, (1, 0, 2)))

    # --- alpha DP (Pallas kernel 2), batch padded onto the lane axis ----------- #
    e_arr = jnp.arange(T - 1)
    row_idx = e_arr[:, None] - k_arr[None, :]                          # (T-1, S) = j_start+1
    row_c = jnp.clip(row_idx, 0, T - 2)
    lp_shift = logpy[row_c, k_arr[None, :], :]                         # (T-1, S, B)
    lp_shift = jnp.where((row_idx >= 1)[:, :, None], lp_shift, NEG_MASK)

    B_pad = ((B + 127) // 128) * 128
    lp_shift_p = jnp.zeros((T - 1, S, B_pad), jnp.float32).at[:, :, :B].set(
        lp_shift.astype(jnp.float32))

    alpha = alpha_forward(lp_shift_p)[:, :B]                           # (T-1, B)

    # --- NLL ------------------------------------------------------------------- #
    idx = jnp.asarray([l - 2 for l in lengths], jnp.int32)             # (B,)
    nll = -alpha[idx, jnp.arange(B)]
    total_length = float(sum(lengths) - 2 * B)
    return jnp.sum(nll) / total_length


# ----------------------------------------------------------------------------- #
if __name__ == "__main__":
    config = dict(
        vocab_size=128,
        embedding_size=32,
        hidden_size=32,
        max_segment_length=4,
        punc_id=3, eng_id=4, num_id=5, eos_id=2,
    )
    B, T_seq = 2, 10
    lengths = [10, 8]

    key = jax.random.PRNGKey(0)
    kp, kx = jax.random.split(key)
    params = make_params(kp, config["vocab_size"], config["embedding_size"])
    x = jax.random.randint(kx, (B, T_seq), 1, config["vocab_size"], dtype=jnp.int32)

    loss = segmental_lm_forward(params, x, lengths, config)
    loss = jax.block_until_ready(loss)
    assert jnp.isfinite(loss)
    print("KERNEL_OK")
</pallas_src>

<mosaic_0001>
module attributes {stable_mosaic.version = 11 : i64} {
  func.func @_vocab_logprob_kernel(%arg0: i32, %arg1: memref<32x128xbf16, #tpu.memory_space<vmem>>, %arg2: memref<1x128xi32, #tpu.memory_space<vmem>>, %arg3: memref<128x32xbf16, #tpu.memory_space<vmem>>, %arg4: memref<128x1xf32, #tpu.memory_space<vmem>>, %arg5: memref<2x128xf32, #tpu.memory_space<vmem>>) attributes {dimension_semantics = [#tpu.dimension_semantics<parallel>], iteration_bounds = array<i64: 1>, scalar_prefetch = 0 : i64, scratch_operands = 0 : i64, tpu.core_type = #tpu.core_type<tc>, window_params = [{transform_indices = @transform_0, window_bounds = array<i64: 32, 128>}, {transform_indices = @transform_1, window_bounds = array<i64: 1, 128>}, {pipeline_mode = #tpu.pipeline_mode<synchronous>, transform_indices = @transform_2, window_bounds = array<i64: 128, 32>}, {pipeline_mode = #tpu.pipeline_mode<synchronous>, transform_indices = @transform_3, window_bounds = array<i64: 128, 1>}, {transform_indices = @transform_4, window_bounds = array<i64: 2, 128>}]} {
    %c0 = arith.constant 0 : index
    %c0_0 = arith.constant 0 : index
    %0 = vector.load %arg3[%c0, %c0_0] : memref<128x32xbf16, #tpu.memory_space<vmem>>, vector<128x32xbf16>
    %c0_1 = arith.constant 0 : index
    %c0_2 = arith.constant 0 : index
    %1 = vector.load %arg1[%c0_1, %c0_2] : memref<32x128xbf16, #tpu.memory_space<vmem>>, vector<32x128xbf16>
    %cst = arith.constant dense<0.000000e+00> : vector<128x128xf32>
    %2 = tpu.matmul %0, %1, %cst {dimension_numbers = #tpu.dot_dimension_numbers<[1], [0], [0], [1], [0, 0, 1, 1], [], []>} : vector<128x32xbf16>, vector<32x128xbf16>, vector<128x128xf32> -> vector<128x128xf32>
    %c0_3 = arith.constant 0 : index
    %c0_4 = arith.constant 0 : index
    %3 = vector.load %arg4[%c0_3, %c0_4] : memref<128x1xf32, #tpu.memory_space<vmem>>, vector<128x1xf32>
    %4 = vector.broadcast %3 : vector<128x1xf32> to vector<128x128xf32>
    %5 = arith.addf %2, %4 : vector<128x128xf32>
    %cst_5 = arith.constant dense<0xFF800000> : vector<128xf32>
    %6 = vector.multi_reduction <maximumf>, %5, %cst_5 [0] : vector<128x128xf32> to vector<128xf32>
    %7 = vector.shape_cast %6 : vector<128xf32> to vector<1x128xf32>
    %8 = vector.broadcast %7 : vector<1x128xf32> to vector<128x128xf32>
    %9 = arith.subf %5, %8 : vector<128x128xf32>
    %10 = math.exp %9 : vector<128x128xf32>
    %cst_6 = arith.constant dense<0.000000e+00> : vector<128xf32>
    %11 = vector.multi_reduction <add>, %10, %cst_6 [0] : vector<128x128xf32> to vector<128xf32>
    %12 = vector.shape_cast %11 : vector<128xf32> to vector<1x128xf32>
    %13 = math.log %12 : vector<1x128xf32>
    %14 = arith.addf %7, %13 : vector<1x128xf32>
    %15 = tpu.iota {dimensions = array<i32: 0>} : vector<128x128xi32>
    %c0_7 = arith.constant 0 : index
    %c0_8 = arith.constant 0 : index
    %16 = vector.load %arg2[%c0_7, %c0_8] : memref<1x128xi32, #tpu.memory_space<vmem>>, vector<1x128xi32>
    %17 = vector.broadcast %16 : vector<1x128xi32> to vector<128x128xi32>
    %18 = arith.cmpi eq, %15, %17 : vector<128x128xi32>
    %cst_9 = arith.constant 0.000000e+00 : f32
    %19 = vector.broadcast %cst_9 : f32 to vector<128x128xf32>
    %20 = arith.select %18, %5, %19 : vector<128x128xi1>, vector<128x128xf32>
    %cst_10 = arith.constant dense<0.000000e+00> : vector<128xf32>
    %21 = vector.multi_reduction <add>, %20, %cst_10 [0] : vector<128x128xf32> to vector<128xf32>
    %22 = vector.shape_cast %21 : vector<128xf32> to vector<1x128xf32>
    %23 = vector.extract_strided_slice %5 {offsets = [2, 0], sizes = [1, 128], strides = [1, 1]} : vector<128x128xf32> to vector<1x128xf32>
    %24 = arith.subf %22, %14 : vector<1x128xf32>
    %25 = arith.subf %23, %14 : vector<1x128xf32>
    %26 = tpu.concatenate %24, %25 in 0 : vector<1x128xf32>, vector<1x128xf32> -> vector<2x128xf32>
    %c0_11 = arith.constant 0 : index
    %c0_12 = arith.constant 0 : index
    %27 = vector.load %arg5[%c0_11, %c0_12] : memref<2x128xf32, #tpu.memory_space<vmem>>, vector<2x128xf32>
    tpu.vector_store %arg5[%c0_11, %c0_12], %26 {strides = array<i32>} : memref<2x128xf32, #tpu.memory_space<vmem>>, vector<2x128xf32>,
    return
  }
  func.func @transform_0(%arg0: i32) -> (i32, i32) {
    %c0_i32 = arith.constant 0 : i32
    %c0_i32_0 = arith.constant 0 : i32
    return %c0_i32, %arg0 : i32, i32
  }
  func.func @transform_1(%arg0: i32) -> (i32, i32) {
    %c0_i32 = arith.constant 0 : i32
    %c0_i32_0 = arith.constant 0 : i32
    return %c0_i32, %arg0 : i32, i32
  }
  func.func @transform_2(%arg0: i32) -> (i32, i32) {
    %c0_i32 = arith.constant 0 : i32
    %c0_i32_0 = arith.constant 0 : i32
    %c0_i32_1 = arith.constant 0 : i32
    return %c0_i32, %c0_i32_0 : i32, i32
  }
  func.func @transform_3(%arg0: i32) -> (i32, i32) {
    %c0_i32 = arith.constant 0 : i32
    %c0_i32_0 = arith.constant 0 : i32
    %c0_i32_1 = arith.constant 0 : i32
    return %c0_i32, %c0_i32_0 : i32, i32
  }
  func.func @transform_4(%arg0: i32) -> (i32, i32) {
    %c0_i32 = arith.constant 0 : i32
    %c0_i32_0 = arith.constant 0 : i32
    return %c0_i32, %arg0 : i32, i32
  }
}

</mosaic_0001>

<bundles_post_ra>
// kernel: tpu_custom_call.1
= control target key start
LH: loop header
LB: loop body
LE: loop exit
PB: predicated region body
PF: predicated region fallthrough
CT: control target
= control target key end

     0   :  { %vm187_vm0 = vcmask 261120   ;;  %v624_v7 = vmov 0   ;;  %s909_s0 = inlined_call_operand.vmem [shape: bf16[32,128], index: 0, kind: input, shape index: {}]   ;;  %s910_s1 = inlined_call_operand.vmem [shape: s32[1,128], index: 1, kind: input, shape index: {}]   ;;  %s911_s2 = inlined_call_operand.vmem [shape: bf16[128,32], index: 2, kind: input, shape index: {}]   ;;  %s912_s3 = inlined_call_operand.vmem [shape: f32[128,1], index: 3, kind: input, shape index: {}]   ;;  %s913_s4 = inlined_call_operand.hbm [shape: f32[2,128], index: 4, kind: output, shape index: {}]  }
   0x1   :  { %v556_v0 = vld [vmem:[%s909_s0] sm:$0xff]   ;;  %v557_v1 = vld [vmem:[%s909_s0 + $0x8] sm:$0xff]   ;;  %v562_v6 = vld [vmem:[%s911_s2 + $0x10] sm:$0xff]   ;;  %555 = vset.pattern.permute.xlu1 %v624_v7  ;;  %554 = vset.pattern.permute.xlu0 %v624_v7 }
   0x2   :  { %528 = vmatprep.subr.bf16.mxu0 %v556_v0  ;;  %548 = vmatprep.subr.bf16.mxu1 %v556_v0  ;;  %v558_v2 = vld [vmem:[%s911_s2] sm:$0xff]   ;;  %v560_v4 = vld [vmem:[%s911_s2 + $0x8] sm:$0xff]   ;;  %v563_v8 = vld [vmem:[%s911_s2 + $0x30] sm:$0xff]  }
   0x3   :  { %529 = vmatpush3.bf16.msra.mxu0 %v556_v0  ;;  %550 = vmatpush3.bf16.msra.mxu1 %v556_v0  ;;  %v559_v3 = vld [vmem:[%s911_s2 + $0x20] sm:$0xff]   ;;  %v561_v5 = vld [vmem:[%s911_s2 + $0x28] sm:$0xff]   ;;  %v41_v9 = vld [vmem:[%s912_s3 + $0x10] sm:$0xff] }
   0x4   :  { %530 = vmatprep.subr.bf16.mxu0 %v557_v1  ;;  %549 = vmatprep.subr.bf16.mxu1 %v557_v1  ;;  %v39_v10 = vld [vmem:[%s912_s3] sm:$0xff]  ;;  %v42_v11 = vld [vmem:[%s912_s3 + $0x18] sm:$0xff]  ;;  %v40_v12 = vld [vmem:[%s912_s3 + $0x8] sm:$0xff] }
   0x5   :  { %532 = vmatprep.mubr.msk.bf16.mxu0 %vm187_vm0, %v558_v2  ;;  %540 = vmatprep.mubr.msk.bf16.mxu1 %vm187_vm0, %v559_v3  ;;  %v564_v13 = vld [vmem:[%s911_s2 + $0x18] sm:$0xff]  }
   0x6   :  { %67 = vperm.xlu1 %555, %v41_v9   ;;  %57 = vperm.xlu0 %554, %v39_v10   ;;  %v565_v14 = vld [vmem:[%s911_s2 + $0x38] sm:$0xff]  }
   0x7   :  { %531 = vmatpush3.bf16.msra.mxu0 %v557_v1  ;;  %551 = vmatpush3.bf16.msra.mxu1 %v557_v1 }
   0xa   :  { %533 = vmatmul.mubr.msk.bf16.vlgmr.msra.gmra.mrb[0].mxu0 %vm187_vm0, %v560_v4  ;;  %541 = vmatmul.mubr.msk.bf16.vlgmr.msra.gmra.mrb[0].mxu1 %vm187_vm0, %v561_v5 }
   0xb   :  { %536 = vmatprep.mubr.msk.bf16.mxu0 %vm187_vm0, %v562_v6  ;;  %544 = vmatprep.mubr.msk.bf16.mxu1 %vm187_vm0, %v563_v8 }
   0xc   :  { %9 = vsyncpa [#allocation3], 0  ;;  %72 = vperm.xlu1 %555, %v42_v11   ;;  %62 = vperm.xlu0 %554, %v40_v12   ;;  %v44_v15 = vld [vmem:[%s912_s3 + $0x28] sm:$0xff]  ;;  %v43_v16 = vld [vmem:[%s912_s3 + $0x20] sm:$0xff]  ;;  %v402_v37 = vlaneseq }
   0xd   :  { %v46_v17 = vld [vmem:[%s912_s3 + $0x38] sm:$0xff]  ;;  %v45_v18 = vld [vmem:[%s912_s3 + $0x30] sm:$0xff]  ;;  %v48_v19 = vld [vmem:[%s912_s3 + $0x48] sm:$0xff] }
   0xe   :  { %v47_v20 = vld [vmem:[%s912_s3 + $0x40] sm:$0xff]  ;;  %v50_v21 = vld [vmem:[%s912_s3 + $0x58] sm:$0xff]  ;;  %v49_v22 = vld [vmem:[%s912_s3 + $0x50] sm:$0xff]  ;;  %v743_v38 = vshrl.u32 %v402_v37, 7 }
   0xf   :  { %v52_v23 = vld [vmem:[%s912_s3 + $0x68] sm:$0xff]  ;;  %v51_v24 = vld [vmem:[%s912_s3 + $0x60] sm:$0xff]  ;;  %v54_v25 = vld [vmem:[%s912_s3 + $0x78] sm:$0xff] }
  0x10   :  { %82 = vperm.xlu1 %555, %v44_v15   ;;  %77 = vperm.xlu0 %554, %v43_v16   ;;  %v53_v26 = vld [vmem:[%s912_s3 + $0x70] sm:$0xff]  ;;  %v404_v41 = vadd.s32 8, %v743_v38  ;;  %v749_v43 = vld [vmem:[%s910_s1] ss:$0 sm:$0xff]  ;;  %v405_v45 = vadd.s32 16, %v743_v38  ;;  %v406_v51 = vadd.s32 24, %v743_v38 }
  0x11   :  { %vm424_vm1 = vcmp.eq.s32.totalorder %v743_v38, %v749_v43  ;;  %v409_v56 = vadd.s32 48, %v743_v38  ;;  %v407_v57 = vadd.s32 32, %v743_v38  ;;  %v410_v62 = vadd.s32 56, %v743_v38  ;;  %s625_s1 = smov [#allocation2]  }
  0x12   :  { %537 = vmatmul.mubr.msk.bf16.gmra.mrb[4].mxu0 %vm187_vm0, %v564_v13  ;;  %545 = vmatmul.mubr.msk.bf16.gmra.mrb[4].mxu1 %vm187_vm0, %v565_v14  ;;  %vm425_vm2 = vcmp.eq.s32.totalorder %v404_v41, %v749_v43  ;;  %vm426_vm3 = vcmp.eq.s32.totalorder %v405_v45, %v749_v43  ;;  %vm427_vm4 = vcmp.eq.s32.totalorder %v406_v51, %v749_v43  ;;  %v408_v1 = vadd.s32 40, %v743_v38  ;;  %s491_s13 = sshll.u32 %s625_s1, 4  ;;  %s492_s13 = int_to_ptr.vmem [resolvable:$true] %s491_s13 }
  0x13   :  { %v411_v3 = vadd.s32 64, %v743_v38  ;;  %v412_v7 = vadd.s32 72, %v743_v38  ;;  %vm428_vm5 = vcmp.eq.s32.totalorder %v407_v57, %v749_v43  ;;  %vm430_vm6 = vcmp.eq.s32.totalorder %v409_v56, %v749_v43  ;;  %s600_s14 = scalar_lea.vmem %s492_s13, 32  ;;  %p605_p1 = scmp.lt.s32.totalorder %s492_s13, %s492_s13 }
  0x14   :  { %92 = vperm.xlu1 %555, %v46_v17   ;;  %87 = vperm.xlu0 %554, %v45_v18   ;;  %vm431_vm7 = vcmp.eq.s32.totalorder %v410_v62, %v749_v43  ;;  %vm429_vm8 = vcmp.eq.s32.totalorder %v408_v1, %v749_v43  ;;  %v416_v1 = vadd.s32 104, %v743_v38  ;;  %p601_p0 = scmp.ne.s32.totalorder %s492_s13, %s600_s14  ;;  %p606_p2 = scmp.lt.s32.totalorder %s600_s14, %s600_s14 }
  0x15   :  { %vm432_vm9 = vcmp.eq.s32.totalorder %v411_v3, %v749_v43  ;;  %vm433_vm10 = vcmp.eq.s32.totalorder %v412_v7, %v749_v43 }
  0x16   :  { %vm437_vm14 = vcmp.eq.s32.totalorder %v416_v1, %v749_v43  ;;  %p607_p3 = por %p606_p2, %p605_p1 }
  0x18   :  { %102 = vperm.xlu1 %555, %v48_v19   ;;  %97 = vperm.xlu0 %554, %v47_v20   ;;  %p608_p4 = pnand %p607_p3, %p601_p0 }
  0x1c   :  { %112 = vperm.xlu1 %555, %v50_v21   ;;  %107 = vperm.xlu0 %554, %v49_v22  }
  0x20   :  { %122 = vperm.xlu1 %555, %v52_v23   ;;  %117 = vperm.xlu0 %554, %v51_v24  }
  0x24   :  { %132 = vperm.xlu1 %555, %v54_v25   ;;  %127 = vperm.xlu0 %554, %v53_v26  }
  0x85   :  { %v68_v27 = vpop.permute.xlu1 %67  ;;  %v58_v28 = vpop.permute.xlu0 %57 }
  0x8b   :  { %v73_v29 = vpop.permute.xlu1 %72  ;;  %v63_v30 = vpop.permute.xlu0 %62 }
  0x8f   :  { %v737_v31 = vpop.permute.xlu1 %82  ;;  %v78_v32 = vpop.permute.xlu0 %77 }
  0x93   :  { %v739_v33 = vpop.permute.xlu1 %92  ;;  %v88_v34 = vpop.permute.xlu0 %87 }
  0x97   :  { %v741_v35 = vpop.permute.xlu1 %102  ;;  %v98_v36 = vpop.permute.xlu0 %97 }
  0x9b   :  { %v113_v39 = vpop.permute.xlu1 %112  ;;  %v108_v40 = vpop.permute.xlu0 %107 }
  0x9f   :  { %v118_v58 = vpop.permute.xlu0 %117  ;;  %v123_v63 = vpop.permute.xlu1 %122 }
  0xa3   :  { %v128_v20 = vpop.permute.xlu0 %127 }
  0xdd   :  { %v534_v42 = vpop.f32.mrb[0].mxu0  ;;  %v542_v44 = vpop.f32.mrb[0].mxu1 }
  0xde   :  { %v246_v46 = vpop.f32.mrb[1].mxu0  ;;  %v278_v47 = vpop.f32.mrb[1].mxu1  ;;  %v758_v54 = vadd.f32 %v534_v42, %v68_v27  ;;  %v783_v15 = vadd.f32 %v542_v44, %v108_v40 }
  0xdf   :  { %v752_v48 = vadd.f32 %v246_v46, %v58_v28  ;;  %v535_v49 = vpop.f32.mrb[2].mxu0  ;;  %v543_v50 = vpop.f32.mrb[2].mxu1  ;;  %v788_v21 = vadd.f32 %v278_v47, %v98_v36  ;;  %v413_v47 = vadd.s32 80, %v743_v38 }
  0xe0   :  { %v249_v52 = vpop.f32.mrb[3].mxu0  ;;  %v281_v53 = vpop.f32.mrb[3].mxu1  ;;  %v765_v59 = vadd.f32 %v535_v49, %v73_v29  ;;  %v442_v2 = vsel %vm426_vm3, %v758_v54, 0.0  ;;  %v804_v29 = vadd.f32 %v543_v50, %v113_v39 }
  0xe1   :  { %v760_v55 = vadd.f32 %v249_v52, %v63_v30  ;;  %v440_v60 = vsel %vm424_vm1, %v752_v48, 0.0  ;;  %v133_v36 = vpop.permute.xlu1 %132  ;;  %vm434_vm11 = vcmp.eq.s32.totalorder %v413_v47, %v749_v43  ;;  %vm482_vm1 = vcmask 1040384  }
  0xe2   :  { %v443_v11 = vsel %vm427_vm4, %v765_v59, 0.0  ;;  %v450_v3 = vsel %vm434_vm11, %v783_v15, 0.0 }
  0xe3   :  { %v441_v61 = vsel %vm425_vm2, %v760_v55, 0.0 }
  0xe4   :  { %v456_v0 = vadd.f32 %v441_v61, %v440_v60  ;;  %v415_v61 = vadd.s32 96, %v743_v38 }
  0xe5   :  { %v538_v4 = vpop.f32.mrb[4].mxu0  ;;  %v546_v5 = vpop.f32.mrb[4].mxu1 }
  0xe6   :  { %v457_v6 = vadd.f32 %v456_v0, %v442_v2  ;;  %v775_v8 = vadd.f32 %v538_v4, %v88_v34  ;;  %v262_v9 = vpop.f32.mrb[5].mxu0  ;;  %v294_v10 = vpop.f32.mrb[5].mxu1  ;;  %v798_v25 = vadd.f32 %v546_v5, %v128_v20  ;;  %v417_v5 = vadd.s32 112, %v743_v38 }
  0xe7   :  { %v780_v12 = vadd.f32 %v262_v9, %v78_v32  ;;  %v539_v13 = vpop.f32.mrb[6].mxu0  ;;  %v547_v14 = vpop.f32.mrb[6].mxu1  ;;  %v806_v30 = vadd.f32 %v294_v10, %v118_v58  ;;  %v448_v58 = vsel %vm432_vm9, %v788_v21, 0.0  ;;  %vm436_vm13 = vcmp.eq.s32.totalorder %v415_v61, %v749_v43 }
  0xe8   :  { %v311_v16 = vmax.f32 %v758_v54, %v775_v8  ;;  %v458_v17 = vadd.f32 %v457_v6, %v443_v11  ;;  %v265_v18 = vpop.f32.mrb[7].mxu0  ;;  %v297_v19 = vpop.f32.mrb[7].mxu1  ;;  %v796_v24 = vadd.f32 %v539_v13, %v739_v33  ;;  %v812_v33 = vadd.f32 %v281_v53, %v741_v35 }
  0xe9   :  { %v309_v22 = vmax.f32 %v752_v48, %v780_v12  ;;  %v444_v23 = vsel %vm428_vm5, %v780_v12, 0.0  ;;  %v802_v28 = vadd.f32 %v265_v18, %v737_v31  ;;  %v821_v41 = vadd.f32 %v547_v14, %v133_v36 }
  0xea   :  { %v315_v26 = vmax.f32 %v311_v16, %v783_v15  ;;  %v459_v27 = vadd.f32 %v458_v17, %v444_v23  ;;  %v312_v34 = vmax.f32 %v765_v59, %v796_v24  ;;  %v446_v35 = vsel %vm430_vm6, %v775_v8, 0.0 }
  0xeb   :  { %v313_v32 = vmax.f32 %v309_v22, %v788_v21  ;;  %v310_v40 = vmax.f32 %v760_v55, %v802_v28  ;;  %v445_v31 = vsel %vm429_vm8, %v802_v28, 0.0  ;;  %v827_v45 = vadd.f32 %v297_v19, %v123_v63 }
  0xec   :  { %v319_v37 = vmax.f32 %v315_v26, %v798_v25  ;;  %v316_v42 = vmax.f32 %v312_v34, %v804_v29  ;;  %v460_v44 = vadd.f32 %v459_v27, %v445_v31  ;;  %v447_v51 = vsel %vm431_vm7, %v796_v24, 0.0 }
  0xed   :  { %v317_v39 = vmax.f32 %v313_v32, %v806_v30  ;;  %v314_v46 = vmax.f32 %v310_v40, %v812_v33  ;;  %v414_v53 = vadd.s32 88, %v743_v38  ;;  %v449_v0 = vsel %vm433_vm10, %v812_v33, 0.0 }
  0xee   :  { %v320_v49 = vmax.f32 %v316_v42, %v821_v41  ;;  %v461_v50 = vadd.f32 %v460_v44, %v446_v35  ;;  %v418_v10 = vadd.s32 120, %v743_v38  ;;  %v452_v13 = vsel %vm436_vm13, %v806_v30, 0.0 }
  0xef   :  { %v318_v52 = vmax.f32 %v314_v46, %v827_v45  ;;  %vm435_vm12 = vcmp.eq.s32.totalorder %v414_v53, %v749_v43  ;;  %vm438_vm15 = vcmp.eq.s32.totalorder %v417_v5, %v749_v43  ;;  %v453_v18 = vsel %vm437_vm14, %v827_v45, 0.0 }
  0xf0   :  { %v322_v56 = vmax.f32 %v319_v37, %v320_v49  ;;  %v462_v57 = vadd.f32 %v461_v50, %v447_v51  ;;  %v451_v7 = vsel %vm435_vm12, %v804_v29, 0.0  ;;  %vm439_vm0 = vcmp.eq.s32.totalorder %v418_v10, %v749_v43 }
  0xf1   :  { %v321_v60 = vmax.f32 %v317_v39, %v318_v52  ;;  %v454_v20 = vsel %vm438_vm15, %v798_v25, 0.0  ;;  %v455_v38 = vsel %vm439_vm0, %v821_v41, 0.0 }
  0xf2   :  { %v463_v63 = vadd.f32 %v462_v57, %v448_v58 }
  0xf3   :  { %v323_v62 = vmax.f32 %v321_v60, %v322_v56 }
  0xf4   :  { %v464_v2 = vadd.f32 %v463_v63, %v449_v0 }
  0xf5   :  { %v324_v4 = vrot.slane %v323_v62, 4 }
  0xf6   :  { %v465_v6 = vadd.f32 %v464_v2, %v450_v3 }
  0xf7   :  { %v325_v9 = vmax.f32 %v323_v62, %v324_v4 }
  0xf8   :  { %v466_v11 = vadd.f32 %v465_v6, %v451_v7 }
  0xf9   :  { %v326_v14 = vrot.slane %v325_v9, 2 }
  0xfa   :  { %v467_v16 = vadd.f32 %v466_v11, %v452_v13 }
  0xfb   :  { %v327_v17 = vmax.f32 %v325_v9, %v326_v14 }
  0xfc   :  { %v468_v19 = vadd.f32 %v467_v16, %v453_v18 }
  0xfd   :  { %v328_v22 = vrot.slane %v327_v17, 1 }
  0xfe   :  { %v469_v23 = vadd.f32 %v468_v19, %v454_v20 }
  0xff   :  { %v857_v26 = vmax.f32 %v327_v17, %v328_v22 }
 0x100   :  { %v859_v27 = vadd.f32 %v469_v23, %v455_v38 }
 0x101   :  { %v330_v32 = vsub.f32 %v752_v48, %v857_v26  ;;  %v331_v34 = vsub.f32 %v760_v55, %v857_v26  ;;  %v332_v43 = vsub.f32 %v758_v54, %v857_v26  ;;  %v333_v36 = vsub.f32 %v765_v59, %v857_v26 }
 0x102   :  { %v334_v40 = vsub.f32 %v780_v12, %v857_v26  ;;  %v335_v42 = vsub.f32 %v802_v28, %v857_v26  ;;  %v336_v55 = vsub.f32 %v775_v8, %v857_v26  ;;  %v337_v59 = vsub.f32 %v796_v24, %v857_v26 }
 0x103   :  { %v346_v37 = vmul.f32 1.442695, %v330_v32  ;;  %v348_v31 = vmul.f32 1.442695, %v331_v34  ;;  %v350_v39 = vmul.f32 1.442695, %v332_v43  ;;  %v338_v12 = vsub.f32 %v788_v21, %v857_v26 }
 0x104   :  { %v352_v44 = vmul.f32 1.442695, %v333_v36  ;;  %v354_v54 = vmul.f32 1.442695, %v334_v40  ;;  %v356_v35 = vmul.f32 1.442695, %v335_v42  ;;  %v339_v28 = vsub.f32 %v812_v33, %v857_v26 }
 0x105   :  { %566 = vpow2.f32 %v346_v37  ;;  %v358_v46 = vmul.f32 1.442695, %v336_v55  ;;  %v360_v47 = vmul.f32 1.442695, %v337_v59  ;;  %v340_v8 = vsub.f32 %v783_v15, %v857_v26 }
 0x106   :  { %568 = vpow2.f32 %v348_v31  ;;  %v362_v51 = vmul.f32 1.442695, %v338_v12  ;;  %v341_v53 = vsub.f32 %v804_v29, %v857_v26  ;;  %v364_v21 = vmul.f32 1.442695, %v339_v28 }
 0x107   :  { %570 = vpow2.f32 %v350_v39  ;;  %v342_v33 = vsub.f32 %v806_v30, %v857_v26  ;;  %v366_v58 = vmul.f32 1.442695, %v340_v8  ;;  %v343_v15 = vsub.f32 %v827_v45, %v857_v26 }
 0x108   :  { %572 = vpow2.f32 %v352_v44  ;;  %v368_v63 = vmul.f32 1.442695, %v341_v53  ;;  %v344_v29 = vsub.f32 %v798_v25, %v857_v26  ;;  %v345_v4 = vsub.f32 %v821_v41, %v857_v26 }
 0x109   :  { %574 = vpow2.f32 %v354_v54  ;;  %v370_v1 = vmul.f32 1.442695, %v342_v33  ;;  %v372_v30 = vmul.f32 1.442695, %v343_v15  ;;  %v471_v40 = vrot.slane %v859_v27, 4 }
 0x10a   :  { %576 = vpow2.f32 %v356_v35  ;;  %v374_v45 = vmul.f32 1.442695, %v344_v29  ;;  %v376_v10 = vmul.f32 1.442695, %v345_v4 }
 0x10b   :  { %578 = vpow2.f32 %v358_v46  ;;  %v472_v42 = vadd.f32 %v471_v40, %v859_v27 }
 0x10c   :  { %580 = vpow2.f32 %v360_v47 }
 0x10d   :  { %582 = vpow2.f32 %v362_v51  ;;  %v473_v55 = vrot.slane %v472_v42, 2 }
 0x10e   :  { %584 = vpow2.f32 %v364_v21 }
 0x10f   :  { %v567_v49 = vpop.eup %566  ;;  %586 = vpow2.f32 %v366_v58  ;;  %v474_v54 = vadd.f32 %v473_v55, %v472_v42 }
 0x110   :  { %v569_v50 = vpop.eup %568  ;;  %588 = vpow2.f32 %v368_v63 }
 0x111   :  { %v378_v24 = vadd.f32 %v569_v50, %v567_v49  ;;  %v571_v52 = vpop.eup %570  ;;  %590 = vpow2.f32 %v370_v1  ;;  %v475_v59 = vrot.slane %v474_v54, 1 }
 0x112   :  { %v573_v57 = vpop.eup %572  ;;  %592 = vpow2.f32 %v372_v30 }
 0x113   :  { %v379_v56 = vadd.f32 %v571_v52, %v378_v24  ;;  %v575_v61 = vpop.eup %574  ;;  %594 = vpow2.f32 %v374_v45  ;;  %v476_v28 = vadd.f32 %v475_v59, %v474_v54 }
 0x114   :  { %v577_v62 = vpop.eup %576  ;;  %596 = vpow2.f32 %v376_v10 }
 0x115   :  { %v380_v60 = vadd.f32 %v573_v57, %v379_v56  ;;  %v579_v3 = vpop.eup %578 }
 0x116   :  { %v581_v6 = vpop.eup %580 }
 0x117   :  { %v381_v0 = vadd.f32 %v575_v61, %v380_v60  ;;  %v583_v9 = vpop.eup %582 }
 0x118   :  { %v585_v13 = vpop.eup %584 }
 0x119   :  { %v382_v2 = vadd.f32 %v577_v62, %v381_v0  ;;  %v587_v14 = vpop.eup %586 }
 0x11a   :  { %v589_v17 = vpop.eup %588 }
 0x11b   :  { %v383_v5 = vadd.f32 %v579_v3, %v382_v2  ;;  %v591_v19 = vpop.eup %590 }
 0x11c   :  { %v593_v41 = vpop.eup %592 }
 0x11d   :  { %v384_v7 = vadd.f32 %v581_v6, %v383_v5  ;;  %v595_v23 = vpop.eup %594 }
 0x11e   :  { %v597_v32 = vpop.eup %596 }
 0x11f   :  { %v385_v11 = vadd.f32 %v583_v9, %v384_v7 }
 0x121   :  { %v386_v25 = vadd.f32 %v585_v13, %v385_v11 }
 0x123   :  { %v387_v16 = vadd.f32 %v587_v14, %v386_v25 }
 0x125   :  { %v388_v18 = vadd.f32 %v589_v17, %v387_v16 }
 0x127   :  { %v389_v20 = vadd.f32 %v591_v19, %v388_v18 }
 0x129   :  { %v390_v22 = vadd.f32 %v593_v41, %v389_v20 }
 0x12b   :  { %v391_v38 = vadd.f32 %v595_v23, %v390_v22 }
 0x12d   :  { %v392_v34 = vadd.f32 %v597_v32, %v391_v38 }
 0x12f   :  { %v393_v43 = vrot.slane %v392_v34, 4 }
 0x131   :  { %v394_v36 = vadd.f32 %v393_v43, %v392_v34 }
 0x133   :  { %v395_v37 = vrot.slane %v394_v36, 2 }
 0x135   :  { %v396_v31 = vadd.f32 %v395_v37, %v394_v36 }
 0x137   :  { %v397_v39 = vrot.slane %v396_v31, 1 }
 0x139   :  { %v398_v44 = vadd.f32 %v397_v39, %v396_v31 }
 0x13b   :  { %598 = vlog2.f32 %v398_v44 }
 0x145   :  { %v599_v35 = vpop.eup %598 }
 0x146   :  { %v400_v12 = vmul.f32 0.6931472, %v599_v35 }
 0x148   :  { %v401_v46 = vadd.f32 %v400_v12, %v857_v26 }
 0x14a   :  { %v477_v47 = vsub.f32 %v476_v28, %v401_v46  ;;  %v478_v49 = vsub.f32 %v752_v48, %v401_v46 }
 0x14c   :  { %v480_v50 = vrot.slane %v478_v49, 1 }
 0x14e   :  { %v483_v8 = vsel %vm482_vm1, %v477_v47, %v480_v50 }
 0x14f   :  { %484 = vst [vmem:[#allocation2] sm:$0x3] %v483_v8 }
 0x150   :  { %611 = shalt.err (!%p608_p4)
}
 0x151   :  { %s612_s17 = scalar_lea.hbm %s913_s4, 32 }
 0x152   :  { %p613_p5 = scmp.ne.s32.totalorder %s913_s4, %s612_s17  ;;  %p616_p6 = scmp.lt.u32.totalorder %s612_s17, %s913_s4 }
 0x154   :  { %p618_p7 = pnand %p616_p6, %p613_p5 }
 0x156   :  { %621 = shalt.err (!%p618_p7)
}
 0x157   :  { %494 = dma.vmem_to_hbm [thread:$0]  %s492_s13, 32, %s913_s4, [#allocation3]  }
 0x158   :  { %622 = dma.done.wait [#allocation3], 32  }
 0x159   :  { %623 = vsyncadd [#allocation3], 4294967264 }
 0x15a   :  { %498 = vsyncpa [#allocation3], 1 }

</bundles_post_ra>
